<compile_context>
chip_gen: v6e
topology: v6e:2x2x1
jax: 0.10.0
libtpu: 0.0.40
codegen_flags: <defaults>
</compile_context>

<pallas_src>
import functools

import jax
import jax.numpy as jnp
from jax import lax
from jax.experimental import pallas as pl
from jax.experimental.pallas import tpu as pltpu

# Large finite negative used both for masking and for the running-max init:
# exp(_MASK_VALUE - m) underflows to exactly 0, so no -inf / isfinite guards.
_MASK_VALUE = -1e30


def _flash_fwd_kernel(q_ref, k_ref, v_ref, o_ref, m_sc, l_sc, acc_sc, *,
                      causal, tq, tk):
    """Online-softmax flash attention. Grid = (bh, q_tiles, k_tiles)."""
    qi = pl.program_id(1)
    ki = pl.program_id(2)

    @pl.when(ki == 0)
    def _():
        m_sc[...] = jnp.full_like(m_sc, _MASK_VALUE)
        l_sc[...] = jnp.zeros_like(l_sc)
        acc_sc[...] = jnp.zeros_like(acc_sc)

    def body():
        q = q_ref[0]      # (tq, d) bf16, already scaled by d**-0.5
        k = k_ref[0]      # (tk, d) bf16
        v = v_ref[0]      # (tk, d) bf16

        # QK^T on the MXU, f32 accumulation: (tq, tk)
        s = lax.dot_general(q, k, (((1,), (1,)), ((), ())),
                            preferred_element_type=jnp.float32)

        if causal:
            q_idx = qi * tq + lax.broadcasted_iota(jnp.int32, (tq, tk), 0)
            k_idx = ki * tk + lax.broadcasted_iota(jnp.int32, (tq, tk), 1)
            s = jnp.where(q_idx >= k_idx, s, _MASK_VALUE)

        m_prev = m_sc[...]                                    # (tq, 1)
        m_new = jnp.maximum(m_prev, s.max(axis=-1, keepdims=True))
        alpha = jnp.exp(m_prev - m_new)                       # rescale factor
        p = jnp.exp(s - m_new)                                # (tq, tk) f32

        l_sc[...] = alpha * l_sc[...] + p.sum(axis=-1, keepdims=True)
        # PV on the MXU in bf16, f32 accumulation.
        acc_sc[...] = alpha * acc_sc[...] + jnp.dot(
            p.astype(v.dtype), v, preferred_element_type=jnp.float32)
        m_sc[...] = m_new

    if causal:
        # Skip k tiles that are entirely above the diagonal (~2x less work).
        pl.when(ki * tk <= qi * tq + (tq - 1))(body)
    else:
        body()

    @pl.when(ki == pl.num_programs(2) - 1)
    def _():
        l = jnp.maximum(l_sc[...], 1e-30)
        o_ref[0] = (acc_sc[...] * pl.reciprocal(l, approx=True)).astype(o_ref.dtype)


def flash_attention_pallas(q, k, v, *, causal=False,
                           q_bucket_size=512, k_bucket_size=1024):
    """q, k, v: (B*H, N, D) bf16 (q pre-scaled by D**-0.5) -> (B*H, N, D) f32."""
    bh, n_q, d = q.shape
    n_k = k.shape[1]

    # Cap tiles so double-buffered k/v tiles + the (tq, tk) f32 score tile stay
    # comfortably inside v7x's 64 MiB VMEM (and the 16/32 MiB scoped defaults).
    tq = min(q_bucket_size, n_q, 256)
    tk = min(k_bucket_size, n_k, 512)
    assert n_q % tq == 0 and n_k % tk == 0, "seq lengths must divide tile sizes"

    kernel = functools.partial(_flash_fwd_kernel, causal=causal, tq=tq, tk=tk)

    return pl.pallas_call(
        kernel,
        out_shape=jax.ShapeDtypeStruct((bh, n_q, d), jnp.float32),
        grid_spec=pltpu.PrefetchScalarGridSpec(
            num_scalar_prefetch=0,
            grid=(bh, n_q // tq, n_k // tk),   # ki (reduction) innermost
            in_specs=[
                pl.BlockSpec((1, tq, d), lambda b, qi, ki: (b, qi, 0)),
                pl.BlockSpec((1, tk, d), lambda b, qi, ki: (b, ki, 0)),
                pl.BlockSpec((1, tk, d), lambda b, qi, ki: (b, ki, 0)),
            ],
            out_specs=pl.BlockSpec((1, tq, d), lambda b, qi, ki: (b, qi, 0)),
            scratch_shapes=[
                pltpu.VMEM((tq, 1), jnp.float32),   # running max m
                pltpu.VMEM((tq, 1), jnp.float32),   # running sum l
                pltpu.VMEM((tq, d), jnp.float32),   # output accumulator
            ],
        ),
        compiler_params=pltpu.CompilerParams(
            dimension_semantics=("parallel", "parallel", "arbitrary"),
            vmem_limit_bytes=32 * 1024 * 1024,
        ),
    )(q, k, v)


class FlashAttentionJax:
    """JAX/Pallas re-implementation of the PyTorch FlashAttention forward pass."""

    def __init__(self, *, dim, heads=8, dim_head=64, causal=False,
                 q_bucket_size=512, k_bucket_size=1024, key=None):
        self.heads = heads
        self.dim_head = dim_head
        self.causal = causal
        self.q_bucket_size = q_bucket_size
        self.k_bucket_size = k_bucket_size
        inner_dim = heads * dim_head

        key = jax.random.PRNGKey(0) if key is None else key
        k1, k2, k3 = jax.random.split(key, 3)
        # nn.Linear weights: (out_features, in_features), no bias.
        init = lambda k, o, i: jax.random.normal(k, (o, i), jnp.float32) / jnp.sqrt(i)
        self.w_q = init(k1, inner_dim, dim)
        self.w_kv = init(k2, inner_dim * 2, dim)
        self.w_out = init(k3, dim, inner_dim)

    def __call__(self, x, context=None, mask=None,
                 q_bucket_size=None, k_bucket_size=None):
        # TODO(synk): key-padding `mask` argument is not supported in this kernel.
        assert mask is None
        q_bucket_size = q_bucket_size or self.q_bucket_size
        k_bucket_size = k_bucket_size or self.k_bucket_size
        context = x if context is None else context

        b, n, _ = x.shape
        n_ctx = context.shape[1]
        h, d = self.heads, self.dim_head

        # projections (glue matmuls, y = x @ W^T as in nn.Linear)
        q = x @ self.w_q.T                                   # (B, N, H*D)
        kv = context @ self.w_kv.T                           # (B, Nc, 2*H*D)
        k, v = jnp.split(kv, 2, axis=-1)

        def split_heads(t, seq):
            return (t.reshape(b, seq, h, d)
                     .transpose(0, 2, 1, 3)
                     .reshape(b * h, seq, d))

        # Fold softmax scale into q once (hoisted out of the kernel's k loop),
        # then cast q/k/v to bf16 so the kernel matmuls hit MXU bf16 peak.
        q = (split_heads(q, n) * (d ** -0.5)).astype(jnp.bfloat16)
        k = split_heads(k, n_ctx).astype(jnp.bfloat16)
        v = split_heads(v, n_ctx).astype(jnp.bfloat16)

        out = flash_attention_pallas(
            q, k, v, causal=self.causal,
            q_bucket_size=q_bucket_size, k_bucket_size=k_bucket_size,
        )                                                    # (B*H, N, D) f32

        out = (out.reshape(b, h, n, d)
                  .transpose(0, 2, 1, 3)
                  .reshape(b, n, h * d))
        return out @ self.w_out.T


def _reference_attention(module, x, context=None):
    """Plain-JAX reference with the same bf16 matmul precision, for checking."""
    context = x if context is None else context
    b, n, _ = x.shape
    n_ctx = context.shape[1]
    h, d = module.heads, module.dim_head
    q = x @ module.w_q.T
    kv = context @ module.w_kv.T
    k, v = jnp.split(kv, 2, axis=-1)
    resh = lambda t, s: t.reshape(b, s, h, d).transpose(0, 2, 1, 3)
    q = (resh(q, n) * (d ** -0.5)).astype(jnp.bfloat16)
    k = resh(k, n_ctx).astype(jnp.bfloat16)
    v = resh(v, n_ctx).astype(jnp.bfloat16)
    s = jnp.einsum("bhqd,bhkd->bhqk", q, k, preferred_element_type=jnp.float32)
    if module.causal:
        mask = jnp.tril(jnp.ones((n, n_ctx), bool))
        s = jnp.where(mask, s, _MASK_VALUE)
    p = jax.nn.softmax(s, axis=-1)
    o = jnp.einsum("bhqk,bhkd->bhqd", p.astype(jnp.bfloat16), v,
                   preferred_element_type=jnp.float32)
    o = o.transpose(0, 2, 1, 3).reshape(b, n, h * d)
    return o @ module.w_out.T


if __name__ == "__main__":
    key = jax.random.PRNGKey(0)
    k_x, k_w = jax.random.split(key)

    batch, seq, dim = 2, 16, 32
    x = jax.random.normal(k_x, (batch, seq, dim), jnp.float32)

    # Exercise both the non-causal path and the causal tile-skip/mask path,
    # with multiple q/k tiles (seq=16, bucket=8) to exercise the online softmax.
    for causal in (False, True):
        module = FlashAttentionJax(dim=dim, heads=4, dim_head=16, causal=causal,
                                   q_bucket_size=8, k_bucket_size=8, key=k_w)
        out = jax.block_until_ready(module(x))
        ref = _reference_attention(module, x)
        assert out.shape == (batch, seq, dim), out.shape
        assert jnp.allclose(out, ref, atol=2e-2, rtol=2e-2), \
            f"mismatch vs reference (causal={causal})"

    print("KERNEL_OK")
</pallas_src>

<mosaic_0001>
module attributes {stable_mosaic.version = 11 : i64} {
  func.func @_flash_fwd_kernel(%arg0: i32, %arg1: i32, %arg2: i32, %arg3: memref<1x8x16xbf16, #tpu.memory_space<vmem>>, %arg4: memref<1x8x16xbf16, #tpu.memory_space<vmem>>, %arg5: memref<1x8x16xbf16, #tpu.memory_space<vmem>>, %arg6: memref<1x8x16xf32, #tpu.memory_space<vmem>>, %arg7: memref<8x1xf32, #tpu.memory_space<vmem>>, %arg8: memref<8x1xf32, #tpu.memory_space<vmem>>, %arg9: memref<8x16xf32, #tpu.memory_space<vmem>>) attributes {dimension_semantics = [#tpu.dimension_semantics<parallel>, #tpu.dimension_semantics<parallel>, #tpu.dimension_semantics<arbitrary>], iteration_bounds = array<i64: 8, 2, 2>, scalar_prefetch = 0 : i64, scratch_operands = 3 : i64, tpu.core_type = #tpu.core_type<tc>, window_params = [{transform_indices = @transform_0, window_bounds = array<i64: 1, 8, 16>}, {transform_indices = @transform_1, window_bounds = array<i64: 1, 8, 16>}, {transform_indices = @transform_2, window_bounds = array<i64: 1, 8, 16>}, {transform_indices = @transform_3, window_bounds = array<i64: 1, 8, 16>}]} {
    %c0_i32 = arith.constant 0 : i32
    %0 = arith.cmpi eq, %arg2, %c0_i32 : i32
    %1 = arith.extui %0 : i1 to i32
    %c0_i32_0 = arith.constant 0 : i32
    %2 = arith.cmpi ne, %1, %c0_i32_0 : i32
    scf.if %2 {
      %cst_25 = arith.constant -1.000000e+30 : f32
      %36 = vector.broadcast %cst_25 : f32 to vector<8x1xf32>
      %c0_26 = arith.constant 0 : index
      %c0_27 = arith.constant 0 : index
      %37 = vector.load %arg7[%c0_26, %c0_27] : memref<8x1xf32, #tpu.memory_space<vmem>>, vector<8x1xf32>
      tpu.vector_store %arg7[%c0_26, %c0_27], %36 {strides = array<i32>} : memref<8x1xf32, #tpu.memory_space<vmem>>, vector<8x1xf32>,
      %cst_28 = arith.constant 0.000000e+00 : f32
      %38 = vector.broadcast %cst_28 : f32 to vector<8x1xf32>
      %c0_29 = arith.constant 0 : index
      %c0_30 = arith.constant 0 : index
      %39 = vector.load %arg8[%c0_29, %c0_30] : memref<8x1xf32, #tpu.memory_space<vmem>>, vector<8x1xf32>
      tpu.vector_store %arg8[%c0_29, %c0_30], %38 {strides = array<i32>} : memref<8x1xf32, #tpu.memory_space<vmem>>, vector<8x1xf32>,
      %cst_31 = arith.constant 0.000000e+00 : f32
      %40 = vector.broadcast %cst_31 : f32 to vector<8x16xf32>
      %c0_32 = arith.constant 0 : index
      %c0_33 = arith.constant 0 : index
      %41 = vector.load %arg9[%c0_32, %c0_33] : memref<8x16xf32, #tpu.memory_space<vmem>>, vector<8x16xf32>
      tpu.vector_store %arg9[%c0_32, %c0_33], %40 {strides = array<i32>} : memref<8x16xf32, #tpu.memory_space<vmem>>, vector<8x16xf32>,
    } else {
    }
    %c0 = arith.constant 0 : index
    %c0_1 = arith.constant 0 : index
    %c0_2 = arith.constant 0 : index
    %3 = vector.load %arg3[%c0, %c0_1, %c0_2] : memref<1x8x16xbf16, #tpu.memory_space<vmem>>, vector<1x8x16xbf16>
    %4 = vector.shape_cast %3 : vector<1x8x16xbf16> to vector<8x16xbf16>
    %c0_3 = arith.constant 0 : index
    %c0_4 = arith.constant 0 : index
    %c0_5 = arith.constant 0 : index
    %5 = vector.load %arg4[%c0_3, %c0_4, %c0_5] : memref<1x8x16xbf16, #tpu.memory_space<vmem>>, vector<1x8x16xbf16>
    %6 = vector.shape_cast %5 : vector<1x8x16xbf16> to vector<8x16xbf16>
    %c0_6 = arith.constant 0 : index
    %c0_7 = arith.constant 0 : index
    %c0_8 = arith.constant 0 : index
    %7 = vector.load %arg5[%c0_6, %c0_7, %c0_8] : memref<1x8x16xbf16, #tpu.memory_space<vmem>>, vector<1x8x16xbf16>
    %8 = vector.shape_cast %7 : vector<1x8x16xbf16> to vector<8x16xbf16>
    %cst = arith.constant dense<0.000000e+00> : vector<8x8xf32>
    %9 = tpu.matmul %4, %6, %cst {dimension_numbers = #tpu.dot_dimension_numbers<[1], [1], [0], [0], [0, 0, 1, 0], [], []>} : vector<8x16xbf16>, vector<8x16xbf16>, vector<8x8xf32> -> vector<8x8xf32>
    %c0_9 = arith.constant 0 : index
    %c0_10 = arith.constant 0 : index
    %10 = vector.load %arg7[%c0_9, %c0_10] : memref<8x1xf32, #tpu.memory_space<vmem>>, vector<8x1xf32>
    %cst_11 = arith.constant dense<0xFF800000> : vector<8xf32>
    %11 = vector.multi_reduction <maximumf>, %9, %cst_11 [1] : vector<8x8xf32> to vector<8xf32>
    %12 = vector.shape_cast %11 : vector<8xf32> to vector<8x1xf32>
    %13 = arith.maximumf %10, %12 : vector<8x1xf32>
    %14 = arith.subf %10, %13 : vector<8x1xf32>
    %15 = math.exp %14 : vector<8x1xf32>
    %16 = vector.broadcast %13 : vector<8x1xf32> to vector<8x8xf32>
    %17 = arith.subf %9, %16 : vector<8x8xf32>
    %18 = math.exp %17 : vector<8x8xf32>
    %c0_12 = arith.constant 0 : index
    %c0_13 = arith.constant 0 : index
    %19 = vector.load %arg8[%c0_12, %c0_13] : memref<8x1xf32, #tpu.memory_space<vmem>>, vector<8x1xf32>
    %20 = arith.mulf %15, %19 : vector<8x1xf32>
    %cst_14 = arith.constant dense<0.000000e+00> : vector<8xf32>
    %21 = vector.multi_reduction <add>, %18, %cst_14 [1] : vector<8x8xf32> to vector<8xf32>
    %22 = vector.shape_cast %21 : vector<8xf32> to vector<8x1xf32>
    %23 = arith.addf %20, %22 : vector<8x1xf32>
    %c0_15 = arith.constant 0 : index
    %c0_16 = arith.constant 0 : index
    %24 = vector.load %arg8[%c0_15, %c0_16] : memref<8x1xf32, #tpu.memory_space<vmem>>, vector<8x1xf32>
    tpu.vector_store %arg8[%c0_15, %c0_16], %23 {strides = array<i32>} : memref<8x1xf32, #tpu.memory_space<vmem>>, vector<8x1xf32>,
    %c0_17 = arith.constant 0 : index
    %c0_18 = arith.constant 0 : index
    %25 = vector.load %arg9[%c0_17, %c0_18] : memref<8x16xf32, #tpu.memory_space<vmem>>, vector<8x16xf32>
    %26 = vector.broadcast %15 : vector<8x1xf32> to vector<8x16xf32>
    %27 = arith.mulf %26, %25 : vector<8x16xf32>
    %28 = arith.truncf %18 : vector<8x8xf32> to vector<8x8xbf16>
    %cst_19 = arith.constant dense<0.000000e+00> : vector<8x16xf32>
    %29 = tpu.matmul %28, %8, %cst_19 {dimension_numbers = #tpu.dot_dimension_numbers<[1], [0], [0], [1], [0, 0, 1, 1], [], []>} : vector<8x8xbf16>, vector<8x16xbf16>, vector<8x16xf32> -> vector<8x16xf32>
    %30 = arith.addf %27, %29 : vector<8x16xf32>
    %c0_20 = arith.constant 0 : index
    %c0_21 = arith.constant 0 : index
    %31 = vector.load %arg9[%c0_20, %c0_21] : memref<8x16xf32, #tpu.memory_space<vmem>>, vector<8x16xf32>
    tpu.vector_store %arg9[%c0_20, %c0_21], %30 {strides = array<i32>} : memref<8x16xf32, #tpu.memory_space<vmem>>, vector<8x16xf32>,
    %c0_22 = arith.constant 0 : index
    %c0_23 = arith.constant 0 : index
    %32 = vector.load %arg7[%c0_22, %c0_23] : memref<8x1xf32, #tpu.memory_space<vmem>>, vector<8x1xf32>
    tpu.vector_store %arg7[%c0_22, %c0_23], %13 {strides = array<i32>} : memref<8x1xf32, #tpu.memory_space<vmem>>, vector<8x1xf32>,
    %c1_i32 = arith.constant 1 : i32
    %33 = arith.cmpi eq, %arg2, %c1_i32 : i32
    %34 = arith.extui %33 : i1 to i32
    %c0_i32_24 = arith.constant 0 : i32
    %35 = arith.cmpi ne, %34, %c0_i32_24 : i32
    scf.if %35 {
      %c0_25 = arith.constant 0 : index
      %c0_26 = arith.constant 0 : index
      %36 = vector.load %arg8[%c0_25, %c0_26] : memref<8x1xf32, #tpu.memory_space<vmem>>, vector<8x1xf32>
      %cst_27 = arith.constant 1.000000e-30 : f32
      %37 = vector.broadcast %cst_27 : f32 to vector<8x1xf32>
      %38 = arith.maximumf %36, %37 : vector<8x1xf32>
      %c0_28 = arith.constant 0 : index
      %c0_29 = arith.constant 0 : index
      %39 = vector.load %arg9[%c0_28, %c0_29] : memref<8x16xf32, #tpu.memory_space<vmem>>, vector<8x16xf32>
      %40 = tpu.reciprocal %38 {approx = true} : vector<8x1xf32> -> vector<8x1xf32>
      %41 = vector.broadcast %40 : vector<8x1xf32> to vector<8x16xf32>
      %42 = arith.mulf %39, %41 : vector<8x16xf32>
      %c0_30 = arith.constant 0 : index
      %c0_31 = arith.constant 0 : index
      %c0_32 = arith.constant 0 : index
      %43 = vector.load %arg6[%c0_30, %c0_31, %c0_32] : memref<1x8x16xf32, #tpu.memory_space<vmem>>, vector<1x8x16xf32>
      %44 = vector.shape_cast %43 : vector<1x8x16xf32> to vector<8x16xf32>
      %45 = vector.shape_cast %42 : vector<8x16xf32> to vector<1x8x16xf32>
      tpu.vector_store %arg6[%c0_30, %c0_31, %c0_32], %45 {strides = array<i32>} : memref<1x8x16xf32, #tpu.memory_space<vmem>>, vector<1x8x16xf32>,
    } else {
    }
    return
  }
  func.func @transform_0(%arg0: i32, %arg1: i32, %arg2: i32) -> (i32, i32, i32) {
    %c0_i32 = arith.constant 0 : i32
    %c0_i32_0 = arith.constant 0 : i32
    return %arg0, %arg1, %c0_i32 : i32, i32, i32
  }
  func.func @transform_1(%arg0: i32, %arg1: i32, %arg2: i32) -> (i32, i32, i32) {
    %c0_i32 = arith.constant 0 : i32
    %c0_i32_0 = arith.constant 0 : i32
    return %arg0, %arg2, %c0_i32 : i32, i32, i32
  }
  func.func @transform_2(%arg0: i32, %arg1: i32, %arg2: i32) -> (i32, i32, i32) {
    %c0_i32 = arith.constant 0 : i32
    %c0_i32_0 = arith.constant 0 : i32
    return %arg0, %arg2, %c0_i32 : i32, i32, i32
  }
  func.func @transform_3(%arg0: i32, %arg1: i32, %arg2: i32) -> (i32, i32, i32) {
    %c0_i32 = arith.constant 0 : i32
    %c0_i32_0 = arith.constant 0 : i32
    return %arg0, %arg1, %c0_i32 : i32, i32, i32
  }
}

</mosaic_0001>

<bundles_post_ra>
// kernel: tpu_custom_call.1
= control target key start
LH: loop header
LB: loop body
LE: loop exit
PB: predicated region body
PF: predicated region fallthrough
CT: control target
= control target key end

     0   :  { %s1386_s0 = inlined_call_operand.hbm [shape: bf16[8,16,16], index: 0, kind: input, shape index: {}]   ;;  %s1387_s1 = inlined_call_operand.hbm [shape: bf16[8,16,16], index: 1, kind: input, shape index: {}]   ;;  %s1388_s2 = inlined_call_operand.hbm [shape: bf16[8,16,16], index: 2, kind: input, shape index: {}]   ;;  %s1389_s3 = inlined_call_operand.hbm [shape: f32[8,16,16], index: 3, kind: output, shape index: {}]  }
   0x1   :  { %1413 = sst [smem:[#allocation31_spill]] %s1387_s1 }
   0x2   :  { %1414 = sst [smem:[#allocation32_spill]] %s1389_s3 }
   0x3   :  { %8 = vsyncpa [#allocation6], 0 }
   0x4   :  { %10 = vsyncpa [#allocation6 + $0x1], 0 }
   0x5   :  { %11 = vsyncpa [#allocation9], 0 }
   0x6   :  { %13 = vsyncpa [#allocation9 + $0x1], 0 }
   0x7   :  { %14 = vsyncpa [#allocation7], 0 }
   0x8   :  { %16 = vsyncpa [#allocation7 + $0x1], 0  ;;  %s1044_s12 = smov 0   ;;  %s1046_s13 = smov 0  }
   0x9   :  { %s1048_s14 = smov 0   ;;  %s1050_s15 = smov 0  }
   0xa   :  { %s1052_s16 = smov 0   ;;  %s1054_s17 = smov 0  }
   0xb   :  { %s1056_s18 = smov 0   ;;  %s1058_s19 = smov 0  }
   0xc   :  { %s1060_s20 = smov 0   ;;  %s1062_s21 = smov 0  }
   0xd   :  { %s1064_s22 = smov 0   ;;  %s1066_s23 = smov 0  }
   0xe   :  { %s1068_s24 = smov 0  }
   0xf LB: > { %1415 = sst [smem:[#allocation15_spill]] %s968_s13  ;;  %s1108_s25 = sadd.s32 4294967295, %s1012_s24   ;;  %s1012_s24 = sphi %s1068_s24, %s22_s24   ;;  %s1008_s23 = sphi %s1066_s23, %s1484_s23   ;;  %s1004_s22 = sphi %s1064_s22, %s1483_s22   ;;  %s1000_s21 = sphi %s1062_s21, %s1482_s21   ;;  %s996_s20 = sphi %s1060_s20, %s1481_s20   ;;  %s992_s19 = sphi %s1058_s19, %s1480_s19   ;;  %s988_s18 = sphi %s1056_s18, %s1479_s18   ;;  %s984_s17 = sphi %s1054_s17, %s1478_s17   ;;  %s980_s16 = sphi %s1052_s16, %s1477_s16   ;;  %s976_s15 = sphi %s1050_s15, %s1470_s15   ;;  %s972_s14 = sphi %s1048_s14, %s1476_s14   ;;  %s968_s13 = sphi %s1046_s13, %s1475_s13   ;;  %s964_s12 = sphi %s1044_s12, %s1469_s12  }
  0x10   : > { %1416 = sst [smem:[#allocation16_spill]] %s976_s15  ;;  %s34_s26 = sadd.s32 1, %s1000_s21 }
  0x11   : > { %1417 = sst [smem:[#allocation17_spill]] %s980_s16  ;;  %p1111_p0 = scmp.ge.s32.totalorder %s34_s26, 2 }
  0x12   : > { %1418 = sst [smem:[#allocation18_spill]] %s988_s18  ;;  %p58_p1 = scmp.eq.s32.totalorder %s1012_s24, 0 }
  0x13   : > { %1419 = sst [smem:[#allocation19_spill]] %s992_s19  ;;  %p64_p2 = scmp.eq.s32.totalorder %s1108_s25, 0 }
  0x14   : > { %1420 = sst [smem:[#allocation20_spill]] %s996_s20  ;;  %s1486_s26 = smov (%p1111_p0, %s34_s26), 0 }
  0x15   : > { %1421 = sst [smem:[#allocation21_spill]] %s1108_s25  ;;  %p85_p3 = scmp.ne.s32.totalorder %s972_s14, %s968_s13 }
  0x16   : > { %p91_p4 = scmp.ne.s32.totalorder %s968_s13, %s964_s12  ;;  %p1392_p7 = scmp.lt.s32.totalorder %s1012_s24, 32 }
  0x17   : > { %p1128_p5 = por %p85_p3, %p58_p1  ;;  %s1391_s5 = sshll.u32 %s1008_s23, 1 }
  0x18   : > { %p1134_p6 = por %p91_p4, %p64_p2  ;;  %s191_s6 = sand.u32 1, %s1012_s24  }
  0x19   : > { %s193_s7 = sand.u32 1, %s972_s14   ;;  %s1147_s9 = sadd.s32 %s1000_s21, %s1391_s5 }
  0x1a   : > { %s1424_s4 = scalar_select %p1134_p6, 1, 0 }
  0x1b   : > { %s1142_s8 = sshll.u32 %s193_s7, 2  ;;  %s1393_s10 = sshll.u32 %s1147_s9, 6 }
  0x1c   : > { %1425 = sst [smem:[#allocation22_spill]] %s1424_s4  ;;  %s195_s28 = scalar_lea.vmem [#allocation8], %s1142_s8 }
  0x1d   : > { %s1426_s1 = sld [smem:[#allocation31_spill]]  ;;  %s204_s3 = sshll.u32 %s195_s28, 4  ;;  %s205_s3 = int_to_ptr.vmem [resolvable:$true] %s204_s3 }
  0x1e   : > { %p1160_p8 = pnand %p1392_p7, %p1128_p5  ;;  %p615_p9 = scmp.ge.s32.totalorder %s1012_s24, 1 }
  0x1f   : > { %s1167_s19 = scalar_lea.sflag [#allocation9], %s191_s6  ;;  %s801_s20 = scalar_lea.vmem %s205_s3, 64 }
  0x20   : > { %s1427_s7 = scalar_select %p1160_p8, 1, 0 }
  0x21   : > { %1429 = sst [smem:[#allocation24_spill]] %s1167_s19  ;;  %p1411_p10 = pneg %p1160_p8 }
  0x22   : > { %1428 = sst [smem:[#allocation23_spill]] %s1427_s7  ;;  %p802_p11 = scmp.ne.s32.totalorder %s205_s3, %s801_s20 }
  0x23   : > { %s202_s29 = scalar_lea.hbm %s1426_s1, %s1393_s10  ;;  %s1014_s28 = smov [#allocation8]  }
  0x24   : > { %p804_p12 = pnand %p802_p11, %p1411_p10  ;;  %s806_s30 = sshll.u32 %s1014_s28, 4  ;;  %s807_s30 = int_to_ptr.vmem [resolvable:$false] %s806_s30 }
  0x25   : > { %s808_s11 = scalar_lea.vmem %s807_s30, 128  ;;  %p809_p3 = scmp.lt.s32.totalorder %s205_s3, %s807_s30 }
  0x26   : > { %p805_p13 = pneg %p804_p12  ;;  %p810_p4 = scmp.lt.s32.totalorder %s808_s11, %s801_s20 }
  0x28   : > { %p811_p5 = por %p810_p4, %p809_p3 }
  0x2a   : > { %p812_p7 = pnand %p811_p5, %p805_p13 }
  0x2c   : > { %815 = shalt.err (!%p812_p7)
}
  0x2d   : > { %659 = dma.hbm_to_vmem [thread:$0]  (!%p1160_p8), %s202_s29, 64, %s205_s3, %s1167_s19  }
  0x2e   : > { %p229_p7 = scmp.lt.s32.totalorder %s1012_s24, 33  ;;  %s603_s6 = sadd.s32 4294967294, %s1012_s24  }
  0x2f   : > { %s37_s12 = sadd.s32 1, %s1004_s22  ;;  %s50_s28 = sadd.s32 1, %s984_s17 }
  0x30   : > { %p1180_p11 = pnand %p615_p9, %p229_p7  ;;  %s1488_s12 = smov (!%p1111_p0, %s37_s12), %s1004_s22 }
  0x31   : > { %p57_p12 = scmp.ne.s32.totalorder %s984_s17, %s980_s16  ;;  %p39_p13 = scmp.ge.s32.totalorder %s1488_s12, 2 }
  0x32   : > { %s1430_s20 = scalar_select %p1180_p11, 1, 0 }
  0x33   : > { %p63_p3 = scmp.ne.s32.totalorder %s980_s16, %s976_s15  ;;  %p1196_p4 = por %p58_p1, %p57_p12 }
  0x34   : > { %1431 = sst [smem:[#allocation25_spill]] %s1430_s20  ;;  %p145_p9 = scmp.eq.s32.totalorder %s1108_s25, 31 }
  0x35   : > { %s1490_s12 = smov (%p39_p13, %s1488_s12), 0  ;;  %s1434_s29 = sadd.s32 1, %s1008_s23 }
  0x36   : > { %1433 = sst [smem:[#allocation26_spill]] %s1490_s12  ;;  %s1492_s29 = smov (!%p39_p13, %s1434_s29), %s1008_s23 }
  0x37   : > { %s46_s27 = ssub.s32 %s1004_s22, %s1490_s12  ;;  %p1210_p0 = por %p64_p2, %p63_p3 }
  0x38   : > { %p43_p1 = scmp.ge.s32.totalorder %s1492_s29, 8  ;;  %p1214_p5 = por %p145_p9, %p57_p12 }
  0x39   : > { %s1435_s30 = scalar_select %p1210_p0, 1, 0 }
  0x3a   : > { %s1437_s11 = scalar_select %p1214_p5, 1, 0 }
  0x3b   : > { %1436 = sst [smem:[#allocation27_spill]] %s1435_s30  ;;  %p151_p7 = scmp.eq.s32.totalorder %s603_s6, 31 }
  0x3c   : > { %1438 = sst [smem:[#allocation28_spill]] %s1437_s11  ;;  %s171_s10 = sand.u32 1, %s984_s17  }
  0x3d   : > { %s1494_s29 = smov (%p43_p1, %s1492_s29), 0  ;;  %p1221_p13 = por %p151_p7, %p63_p3 }
  0x3e   : > { %1439 = sst [smem:[#allocation29_spill]] %s1494_s29  ;;  %s45_s1 = ssub.s32 %s1008_s23, %s1494_s29 }
  0x3f   : > { %s1440_s5 = scalar_select %p1221_p13, 1, 0 }
  0x40   : > { %s606_s12 = sshll.u32 %s171_s10, 2  ;;  %s47_s15 = sor.u32 %s46_s27, %s45_s1 }
  0x41   : > { %1441 = sst [smem:[#allocation30_spill]] %s1440_s5  ;;  %s1442_s18 = ssub.s32 %s1000_s21, %s1486_s26 }
  0x42   : > { %s75_s4 = sor.u32 %s1442_s18, %s45_s1  ;;  %p48_p2 = scmp.eq.s32.totalorder %s47_s15, 0 }
  0x43   : > { %p76_p12 = scmp.eq.s32.totalorder %s75_s4, 0  ;;  %s1443_s6 = sshll.u32 %s1008_s23, 1 }
  0x44   : > { %s180_s11 = sadd.s32 %s1004_s22, %s1443_s6  ;;  %s1444_s25 = sadd.s32 1, %s972_s14 }
  0x45   : > { %s1234_s13 = scalar_select %p48_p2, %s984_s17, %s50_s28  }
  0x46   : > { %s1239_s30 = scalar_select %p76_p12, %s972_s14, %s1444_s25  }
  0x47   : > { %s608_s16 = sshll.u32 %s180_s11, 6  ;;  %s175_s20 = scalar_lea.vmem [#allocation5], %s606_s12 }
  0x48   : > { %s184_s19 = sshll.u32 %s175_s20, 4  ;;  %s182_s29 = scalar_lea.hbm %s1386_s0, %s608_s16  ;;  %s185_s19 = int_to_ptr.vmem [resolvable:$true] %s184_s19 }
  0x49   : > { %p1445_p3 = scmp.lt.s32.totalorder %s1012_s24, 32  ;;  %s215_s15 = scalar_lea.vmem [#allocation10], %s1142_s8 }
  0x4a   : > { %s224_s18 = sshll.u32 %s215_s15, 4  ;;  %s1447_s4 = sshll.u32 %s1147_s9, 6  ;;  %s1260_s18 = int_to_ptr.vmem [resolvable:$true] %s224_s18 }
  0x4b   : > { %p1248_p9 = pnand %p1445_p3, %p1196_p4  ;;  %s1258_s12 = scalar_lea.hbm %s1388_s2, %s1447_s4 }
  0x4c   : > { %s172_s5 = scalar_lea.sflag [#allocation6], %s171_s10  ;;  %s829_s16 = scalar_lea.vmem %s185_s19, 64 }
  0x4d   : > { %p818_p1 = pneg %p1248_p9  ;;  %p830_p7 = scmp.ne.s32.totalorder %s185_s19, %s829_s16 }
  0x4e   : > { %s1015_s7 = smov [#allocation5]  }
  0x4f   : > { %p832_p4 = pnand %p830_p7, %p818_p1  ;;  %s834_s20 = sshll.u32 %s1015_s7, 4  ;;  %s835_s20 = int_to_ptr.vmem [resolvable:$false] %s834_s20 }
  0x50   : > { %s836_s8 = scalar_lea.vmem %s835_s20, 128  ;;  %p837_p12 = scmp.lt.s32.totalorder %s185_s19, %s835_s20 }
  0x51   : > { %p833_p2 = pneg %p832_p4  ;;  %p838_p3 = scmp.lt.s32.totalorder %s836_s8, %s829_s16 }
  0x53   : > { %p839_p10 = por %p838_p3, %p837_p12 }
  0x55   : > { %p840_p13 = pnand %p839_p10, %p833_p2 }
  0x57   : > { %843 = shalt.err (!%p840_p13)
}
  0x58   : > { %656 = dma.hbm_to_vmem [thread:$0]  (!%p1248_p9), %s182_s29, 64, %s185_s19, %s172_s5  }
  0x59   : > { %s857_s10 = scalar_lea.vmem %s1260_s18, 64  ;;  %p1449_p1 = pneg %p1160_p8 }
  0x5a   : > { %p858_p5 = scmp.ne.s32.totalorder %s1260_s18, %s857_s10  ;;  %s1016_s3 = smov [#allocation10]  }
  0x5b   : > { %s862_s27 = sshll.u32 %s1016_s3, 4  ;;  %s863_s27 = int_to_ptr.vmem [resolvable:$false] %s862_s27 }
  0x5c   : > { %p860_p7 = pnand %p858_p5, %p1449_p1  ;;  %s864_s11 = scalar_lea.vmem %s863_s27, 128 }
  0x5d   : > { %p865_p12 = scmp.lt.s32.totalorder %s1260_s18, %s863_s27  ;;  %p866_p10 = scmp.lt.s32.totalorder %s864_s11, %s857_s10 }
  0x5e   : > { %p861_p4 = pneg %p860_p7 }
  0x5f   : > { %p867_p13 = por %p866_p10, %p865_p12 }
  0x61   : > { %p868_p2 = pnand %p867_p13, %p861_p4 }
  0x63   : > { %871 = shalt.err (!%p868_p2)
}
  0x64   : > { %s1450_s6 = sld [smem:[#allocation24_spill]] }
  0x65   : > { %s1452_s29 = sld [smem:[#allocation17_spill]] (!%p1180_p11) }
  0x66   : > { %233 = sbr.rel (%p1180_p11) target bundleno = 997 (0x3e5), region = 32 }
  0x6a   : > { %662 = dma.hbm_to_vmem [thread:$0]  (!%p1160_p8), %s1258_s12, 64, %s1260_s18, %s1450_s6  }
  0x6b   : > { %s1280_s15 = sand.u32 1, %s1452_s29  }
  0x6c   : > { %s616_s4 = sshll.u32 %s1280_s15, 2  ;;  %s236_s25 = scalar_lea.sflag [#allocation6], %s1280_s15 }
  0x6d   : > { %s1284_s28 = scalar_lea.vmem [#allocation5], %s616_s4 }
  0x6e   : > { %951 = dma.done.wait (%p1210_p0), %s236_s25, 64  }
  0x6f   : > { %953 = vsyncadd (%p1210_p0), %s236_s25, 4294967232  ;;  %s1454_s5 = sld [smem:[#allocation21_spill]] }
  0x70   : > { %s1455_s18 = sld [smem:[#allocation15_spill]] }
  0x75   : > { %s244_s16 = sand.u32 1, %s1454_s5  }
  0x76   : > { %s246_s7 = sand.u32 1, %s1455_s18   ;;  %s245_s8 = scalar_lea.sflag [#allocation9], %s244_s16 }
  0x77   : > { %s1292_s20 = sshll.u32 %s246_s7, 2 }
  0x78   : > { %s248_s9 = scalar_lea.vmem [#allocation8], %s1292_s20 }
  0x79   : > { %955 = dma.done.wait (%p1134_p6), %s245_s8, 128  }
  0x7a   : > { %957 = vsyncadd (%p1134_p6), %s245_s8, 4294967168  ;;  %s619_s10 = sshll.u32 %s1280_s15, 3  ;;  %s257_s3 = scalar_lea.vmem [#allocation10], %s1292_s20 }
  0x7b   : > { %s1301_s27 = scalar_lea.vmem [#allocation11], %s619_s10  ;;  %s1457_s11 = sld [smem:[#allocation18_spill]] }
  0x81   : > { %p620_p8 = scmp.ne.s32.totalorder %s1457_s11, 0 }
  0x83   : > { %294 = sbr.rel (%p620_p8) target bundleno = 139 (0x8b), region = 48 }
  0x88   : > { %vm295_vm0 = vcmask 7168   ;;  %vm298_vm1 = vcmask 130048   ;;  %v1017_v0 = vmov -1e+30   ;;  %v1018_v1 = vmov 0.0  }
  0x89   : > { %296 = vst.msk [vmem:[#allocation2] sm:$0xff] %vm295_vm0, %v1017_v0  ;;  %297 = vst.msk [vmem:[#allocation3] sm:$0xff] %vm295_vm0, %v1018_v1 }
  0x8a   : > { %299 = vst.msk [vmem:[#allocation4] sm:$0xff] %vm298_vm1, %v1018_v1 }
  0x8b PF: > { %v301_v2 = vld [vmem:[%s248_s9] sm:$0xf]  ;;  %vm303_vm2 = vcmask 130048   ;;  %v1019_v3 = vmov 0.0   ;;  %vm1020_vm3 = vmmov 0   ;;  %vm351_vm4 = vcmask 64512  }
  0x8c   : > { %633 = vmatprep.subr.bf16.mxu0 %v1019_v3  ;;  %v308_v4 = vsel %vm303_vm2, %v301_v2, 0  ;;  %635 = vmatprep.mubr.msk.bf16.mxu0 %vm1020_vm3, %v1019_v3  ;;  %v300_v5 = vld [vmem:[%s1284_s28] sm:$0xf]  ;;  %v1021_v11 = vmov 0   ;;  %vm373_vm5 = vcmask 7168   ;;  %vm386_vm6 = vcmask 1043456  }
  0x8d   : > { %634 = vmatpush3.bf16.xpose.msra.mxu0 %v308_v4  ;;  %639 = vmatprep.subr.bf16.mxu1 %v1019_v3  ;;  %v302_v16 = vld [vmem:[%s257_s3] sm:$0xf]  ;;  %s1458_s6 = sld [smem:[#allocation18_spill]] }
  0x8e   : > { %641 = vmatprep.mubr.msk.bf16.mxu1 %vm1020_vm3, %v1019_v3  ;;  %779 = vset.pattern.permute.xlu0 %v1021_v11  ;;  %v388_v17 = vsel %vm386_vm6, %v302_v16, 0 }
  0x8f   : > { %780 = vset.pattern.permute.xlu1 %v1021_v11  ;;  %640 = vmatpush3.bf16.msra.mxu1 %v388_v17 }
  0x90   : > { %v350_v12 = vld [vmem:[#allocation2] sm:$0xff]  ;;  %v367_v26 = vld [vmem:[#allocation3] sm:$0xff] }
  0x91   : > { %v375_v30 = vld [vmem:[#allocation4] sm:$0xff] }
  0x93   : > { %p623_p6 = scmp.ne.s32.totalorder %s1458_s6, 1 }
  0x94   : > { %636 = vmatmul.mubr.msk.bf16.vlgmr.msra.gmra.mxu0 %vm303_vm2, %v300_v5 }
 0x154   : > { %v344_v6 = vpop.f32.mrf.mxu0 }
 0x155   : > { %v352_v7 = vsel %vm351_vm4, %v344_v6, -inf }
 0x156   : > { %353 = vmax.xlane.f32.xlu0 %v352_v7  ;;  %v637_v8 = vpop.f32.mrf.mxu0 }
 0x158   : > { %v347_v9 = vpop.f32.mrf.mxu0 }
 0x15a   : > { %v638_v10 = vpop.f32.mrf.mxu0 }
 0x1df   : > { %v354_v13 = vpop.xlane.xlu0 %353 }
 0x1e0   : > { %v355_v14 = vmax.f32 %v350_v12, %v354_v13 }
 0x1e2   : > { %v356_v15 = vsub.f32 %v350_v12, %v355_v14  ;;  %432 = vst.msk [vmem:[#allocation2] sm:$0xff] %vm373_vm5, %v355_v14  ;;  %361 = vperm.xlu0 %779, %v355_v14  }
 0x1e4   : > { %v357_v22 = vmul.f32 1.442695, %v356_v15 }
 0x25d   : > { %v362_v18 = vpop.permute.xlu0 %361 }
 0x25e   : > { %v364_v19 = vsub.f32 %v344_v6, %v362_v18 }
 0x260   : > { %v365_v20 = vmul.f32 1.442695, %v364_v19 }
 0x262   : > { %781 = vpow2.f32 %v365_v20 }
 0x263   : > { %783 = vpow2.f32 %v357_v22 }
 0x26f   : > { %v782_v21 = vpop.eup %781 }
 0x270   : > { %v369_v23 = vsel %vm351_vm4, %v782_v21, 0.0  ;;  %v382_v24 = vpack.c.bf16 %v782_v21, %v782_v21  ;;  %v784_v25 = vpop.eup %783 }
 0x271   : > { %370 = vadd.xlane.f32.xlu1 %v369_v23  ;;  %v368_v27 = vmul.f32 %v784_v25, %v367_v26 }
 0x272   : > { %642 = vmatmul.mubr.msk.bf16.vlgmr.msra.gmra.mxu1 %vm351_vm4, %v382_v24 }
 0x282   : > { %378 = vperm.xlu1 %780, %v784_v25  }
 0x2fa   : > { %v371_v28 = vpop.xlane.xlu1 %370 }
 0x2fb   : > { %v372_v29 = vadd.f32 %v371_v28, %v368_v27 }
 0x2fd   : > { %374 = vst.msk [vmem:[#allocation3] sm:$0xff] %vm373_vm5, %v372_v29 }
 0x2fe   : > { %v379_v31 = vpop.permute.xlu1 %378 }
 0x2ff   : > { %v381_v32 = vmul.f32 %v379_v31, %v375_v30 }
 0x332   : > { %v424_v33 = vpop.f32.mrf.mxu1 }
 0x333   : > { %v430_v34 = vadd.f32 %v424_v33, %v381_v32 }
 0x334   : > { %v643_v35 = vpop.f32.mrf.mxu1  ;;  %436 = sbr.rel (%p623_p6) target bundleno = 969 (0x3c9), region = 52 }
 0x335   : > { %431 = vst.msk [vmem:[#allocation4] sm:$0xff] %vm303_vm2, %v430_v34 }
 0x336   : > { %v427_v36 = vpop.f32.mrf.mxu1 }
 0x338   : > { %v644_v37 = vpop.f32.mrf.mxu1 }
 0x339   : > { %v437_v38 = vld [vmem:[#allocation3] sm:$0xff]  ;;  %v1022_v39 = vmov 0  }
 0x33a   : > { %785 = vset.pattern.permute.xlu0 %v1022_v39  ;;  %v438_v40 = vmax.f32 %v437_v38, 1e-30 }
 0x33c   : > { %786 = vrcp.f32 %v438_v40  ;;  %v439_v42 = vld [vmem:[#allocation4] sm:$0xff] }
 0x349   : > { %v787_v41 = vpop.eup %786 }
 0x34a   : > { %443 = vperm.xlu0 %785, %v787_v41  }
 0x3c5   : > { %v444_v43 = vpop.permute.xlu0 %443 }
 0x3c6   : > { %v446_v44 = vmul.f32 %v444_v43, %v439_v42 }
 0x3c8   : > { %447 = vst.msk [vmem:[%s1301_s27] sm:$0xff] %vm303_vm2, %v446_v44 }
 0x3c9 PF: > { %s1459_s19 = sld [smem:[#allocation20_spill]]  ;;  %s464_s28 = sshll.u32 %s1301_s27, 4  ;;  %s465_s28 = int_to_ptr.vmem [resolvable:$true] %s464_s28 }
 0x3ca   : > { %s1460_s29 = sld [smem:[#allocation19_spill]]  ;;  %s449_s8 = scalar_lea.sflag [#allocation7], %s1280_s15 }
 0x3cb   : > { %s1461_s1 = sld [smem:[#allocation28_spill]]  ;;  %s872_s9 = scalar_lea.vmem %s465_s28, 128 }
 0x3cc   : > { %s1462_s16 = sld [smem:[#allocation32_spill]]  ;;  %p873_p11 = scmp.ne.s32.totalorder %s465_s28, %s872_s9 }
 0x3cd   : > { %s1023_s10 = smov [#allocation11]  }
 0x3ce   : > { %s876_s3 = sshll.u32 %s1023_s10, 4  ;;  %s877_s3 = int_to_ptr.vmem [resolvable:$false] %s876_s3 }
 0x3cf   : > { %s625_s4 = sshll.u32 %s1459_s19, 1  ;;  %s878_s11 = scalar_lea.vmem %s877_s3, 256 }
 0x3d0   : > { %s460_s25 = sadd.s32 %s1460_s29, %s625_s4  ;;  %p879_p3 = scmp.lt.s32.totalorder %s465_s28, %s877_s3 }
 0x3d1   : > { %s626_s5 = sshll.u32 %s460_s25, 7  ;;  %p1464_p0 = scmp.ne.s32.totalorder %s1461_s1, 0 }
 0x3d2   : > { %s1463_s7 = smov %s1462_s16  ;;  %s462_s20 = scalar_lea.hbm %s1462_s16, %s626_s5 }
 0x3d3   : > { %p874_p5 = pnand %p873_p11, %p1464_p0  ;;  %p880_p1 = scmp.lt.s32.totalorder %s878_s11, %s872_s9 }
 0x3d5   : > { %p875_p9 = pneg %p874_p5  ;;  %p881_p7 = por %p880_p1, %p879_p3 }
 0x3d7   : > { %p882_p4 = pnand %p881_p7, %p875_p9 }
 0x3d9   : > { %885 = shalt.err (!%p882_p4)
}
 0x3da   : > { %s886_s27 = scalar_lea.hbm %s462_s20, 128  ;;  %s890_s19 = scalar_lea.hbm %s1463_s7, 2048 }
 0x3db   : > { %p887_p12 = scmp.ne.s32.totalorder %s462_s20, %s886_s27  ;;  %p891_p2 = scmp.lt.s32.totalorder %s462_s20, %s1463_s7 }
 0x3dc   : > { %p892_p8 = scmp.lt.s32.totalorder %s890_s19, %s886_s27 }
 0x3dd   : > { %p888_p10 = pnand %p887_p12, %p1464_p0 }
 0x3de   : > { %p893_p6 = por %p892_p8, %p891_p2 }
 0x3df   : > { %p889_p13 = pneg %p888_p10 }
 0x3e1   : > { %p894_p11 = pnand %p893_p6, %p889_p13 }
 0x3e3   : > { %897 = shalt.err (!%p894_p11)
}
 0x3e4   : > { %651 = dma.vmem_to_hbm [thread:$0]  (%p1464_p0), %s465_s28, 128, %s462_s20, %s449_s8  }
 0x3e5 PF: > { %s1465_s25 = sld [smem:[#allocation16_spill]]  ;;  %p668_p5 = scmp.ge.s32.totalorder %s1012_s24, 2 }
 0x3e6   : > { %s1466_s5 = sld [smem:[#allocation30_spill]] }
 0x3eb   : > { %s476_s18 = sand.u32 1, %s1465_s25  }
 0x3ec   : > { %p1467_p9 = scmp.ne.s32.totalorder %s1466_s5, 0  ;;  %s477_s12 = scalar_lea.sflag [#allocation7], %s476_s18 }
 0x3ee   : > { %p664_p3 = pnand %p668_p5, %p1467_p9 }
 0x3f0   : > { %p665_p1 = pneg %p664_p3 }
 0x3f2   : > { %959 = dma.done.wait (%p665_p1), %s477_s12, 128  }
 0x3f3   : > { %961 = vsyncadd (%p665_p1), %s477_s12, 4294967168  ;;  %s22_s24 = sadd.s32 1, %s1012_s24   ;;  %s1469_s12 = sld [smem:[#allocation15_spill]] }
 0x3f4   : > { %p1342_p7 = scmp.ge.s32.totalorder %s22_s24, 34   ;;  %s1470_s15 = sld [smem:[#allocation17_spill]] }
 0x3f5   : > { %s1471_s1 = smov %s1234_s13  ;;  %s1472_s28 = sld [smem:[#allocation26_spill]] }
 0x3f6   : > { %s1473_s8 = sld [smem:[#allocation29_spill]]  ;;  %s1475_s13 = smov %s972_s14 }
 0x3f7   : > { %s1476_s14 = smov %s1239_s30  ;;  %s1477_s16 = smov %s984_s17 }
 0x3f8   : > { %s1478_s17 = smov %s1471_s1  ;;  %s1479_s18 = smov %s1000_s21 }
 0x3f9   : > { %s1480_s19 = smov %s1004_s22  ;;  %s1481_s20 = smov %s1008_s23 }
 0x3fa   : > { %s1482_s21 = smov %s1486_s26  ;;  %21 = sbr.rel (!%p1342_p7) target bundleno = 15 (0xf), region = 109 }
 0x3fb   : > { %s1483_s22 = smov %s1472_s28 }
 0x3fc   : > { %s1484_s23 = smov %s1473_s8 }
 0x3ff   :  { %482 = vsyncpa [#allocation6], 1 }
 0x400   :  { %484 = vsyncpa [#allocation6 + $0x1], 1 }
 0x401   :  { %485 = vsyncpa [#allocation9], 1 }
 0x402   :  { %487 = vsyncpa [#allocation9 + $0x1], 1 }
 0x403   :  { %488 = vsyncpa [#allocation7], 1 }
 0x404   :  { %490 = vsyncpa [#allocation7 + $0x1], 1 }

</bundles_post_ra>
